<compile_context>
chip_gen: v7x
topology: tpu7x:2x2x1
jax: 0.10.0
libtpu: 0.0.40
codegen_flags: <defaults>
</compile_context>

<pallas_src>
import jax
import jax.numpy as jnp
from jax.experimental import pallas as pl
from jax.experimental.pallas import tpu as pltpu


def _round_up(x: int, m: int) -> int:
    return ((x + m - 1) // m) * m


def _fused_kernel(ids_ref, emb_ref, w1_ref, b1_ref, w2_ref, b2_ref, o_ref):
    # ids_ref: (TN, 1) int32 token ids for this tile
    # emb_ref: (Vp, D1p), w1_ref: (D1p, D2p), b1_ref: (1, D2p),
    # w2_ref: (D2p, Op)  (already scaled by 4), b2_ref: (1, Op) (already scaled by 4)
    ids = ids_ref[...]                                   # (TN, 1) int32
    tn = ids_ref.shape[0]
    vp = emb_ref.shape[0]

    # Embedding lookup as an exact one-hot row-select on the MXU.
    vocab_iota = jax.lax.broadcasted_iota(jnp.int32, (tn, vp), 1)
    onehot = (ids == vocab_iota).astype(jnp.float32)     # (TN, Vp)
    x = jnp.dot(onehot, emb_ref[...], preferred_element_type=jnp.float32)  # (TN, D1p)

    # h = relu(x @ W1 + b1)   (dropout is identity in eval mode)
    h = jnp.dot(x, w1_ref[...], preferred_element_type=jnp.float32) + b1_ref[...]
    h = jnp.maximum(h, 0.0)

    # o = h @ (4*W2) + (4*b2)   (the *4 is folded into the weights)
    o = jnp.dot(h, w2_ref[...], preferred_element_type=jnp.float32) + b2_ref[...]
    o_ref[...] = o.astype(o_ref.dtype)


def prepare_params(params):
    """Zero-pad all lane dims to multiples of 128 and fold the trailing *4 into W2/b2.

    Padding is exact: padded embedding columns are zero, padded W1 rows/cols and b1
    cols are zero (so padded hidden units are relu(0)=0), padded W2 rows/cols and b2
    cols are zero (so padded output lanes are 0 and get sliced away).
    """
    emb, w1, b1, w2, b2 = (params[k] for k in ("emb", "w1", "b1", "w2", "b2"))
    V, D1 = emb.shape
    D2 = w1.shape[1]
    out_dim = w2.shape[1]
    Vp = _round_up(V, 128)
    D1p = _round_up(D1, 128)
    D2p = _round_up(D2, 128)
    Op = _round_up(out_dim, 128)

    def pad2(a, rows, cols):
        return jnp.pad(a, ((0, rows - a.shape[0]), (0, cols - a.shape[1])))

    return {
        "emb": pad2(emb, Vp, D1p),
        "w1": pad2(w1, D1p, D2p),
        "b1": pad2(b1, 1, D2p),
        "w2": pad2(w2 * 4.0, D2p, Op),   # fold *4
        "b2": pad2(b2 * 4.0, 1, Op),     # fold *4
        "out_dim": out_dim,
    }


def make_pos_wl_forward(x_idx, prepared, *, block_tokens=512):
    """x_idx: int32 (B, S) token ids. Returns float32 (B, S, output_dim)."""
    emb_p = prepared["emb"]
    w1_p = prepared["w1"]
    b1_p = prepared["b1"]
    w2_p = prepared["w2"]
    b2_p = prepared["b2"]
    out_dim = prepared["out_dim"]
    Op = w2_p.shape[1]

    B, S = x_idx.shape
    N = B * S

    # Token-axis tiling: TN rows per grid step (multiple of 8), pad ragged tail.
    block_tokens = max(8, _round_up(block_tokens, 8))
    TN = min(block_tokens, _round_up(N, 8))
    Np = _round_up(N, TN)
    grid = (Np // TN,)

    ids = x_idx.reshape(-1).astype(jnp.int32)
    ids = jnp.pad(ids, (0, Np - N))          # pad with id 0 (valid row; sliced away below)
    ids2d = ids.reshape(Np, 1)

    out = pl.pallas_call(
        _fused_kernel,
        out_shape=jax.ShapeDtypeStruct((Np, Op), jnp.float32),
        grid_spec=pl.GridSpec(
            grid=grid,
            in_specs=[
                pl.BlockSpec((TN, 1), lambda i: (i, 0)),            # token ids (tiled)
                pl.BlockSpec(emb_p.shape, lambda i: (0, 0)),        # embedding table (resident)
                pl.BlockSpec(w1_p.shape, lambda i: (0, 0)),         # W1 (resident)
                pl.BlockSpec(b1_p.shape, lambda i: (0, 0)),         # b1 (resident)
                pl.BlockSpec(w2_p.shape, lambda i: (0, 0)),         # 4*W2 (resident)
                pl.BlockSpec(b2_p.shape, lambda i: (0, 0)),         # 4*b2 (resident)
            ],
            out_specs=pl.BlockSpec((TN, Op), lambda i: (i, 0)),     # lane-dense (Op % 128 == 0)
        ),
        compiler_params=pltpu.CompilerParams(
            dimension_semantics=("parallel",),                      # shard token tiles across TCs (v7x)
        ),
    )(ids2d, emb_p, w1_p, b1_p, w2_p, b2_p)

    return out[:N, :out_dim].reshape(B, S, out_dim)


def init_params(key, max_emb, pf_dim1, pf_dim2, output_dim):
    k_emb, k_w1, k_b1, k_w2, k_b2 = jax.random.split(key, 5)
    # Deterministic synthetic init (PyTorch-like scales).
    emb = jax.random.normal(k_emb, (max_emb, pf_dim1), jnp.float32)
    lim1 = 1.0 / jnp.sqrt(pf_dim1)
    w1 = jax.random.uniform(k_w1, (pf_dim1, pf_dim2), jnp.float32, -lim1, lim1)
    b1 = jax.random.uniform(k_b1, (1, pf_dim2), jnp.float32, -lim1, lim1)
    lim2 = 1.0 / jnp.sqrt(pf_dim2)
    w2 = jax.random.uniform(k_w2, (pf_dim2, output_dim), jnp.float32, -lim2, lim2)
    b2 = jax.random.uniform(k_b2, (1, output_dim), jnp.float32, -lim2, lim2)
    return {"emb": emb, "w1": w1, "b1": b1, "w2": w2, "b2": b2}


if __name__ == "__main__":
    # Small shapes consistent with the module's forward.
    B, S = 2, 8
    pf_dim1, pf_dim2, output_dim = 32, 64, 16
    max_Emb = 100
    # dropout rate ignored: module evaluated in eval mode (dropout = identity)

    key = jax.random.PRNGKey(0)
    k_params, k_idx = jax.random.split(key)
    params = init_params(k_params, max_Emb, pf_dim1, pf_dim2, output_dim)
    prepared = prepare_params(params)
    x_idx = jax.random.randint(k_idx, (B, S), 0, max_Emb, dtype=jnp.int32)

    out = make_pos_wl_forward(x_idx, prepared)
    out = jax.block_until_ready(out)

    # Pure-JAX reference check (unpadded, unfused).
    ref = jnp.take(params["emb"], x_idx.reshape(-1), axis=0)
    ref = jnp.maximum(ref @ params["w1"] + params["b1"], 0.0)
    ref = (ref @ params["w2"] + params["b2"]) * 4.0
    ref = ref.reshape(B, S, output_dim)

    assert out.shape == (B, S, output_dim)
    assert jnp.allclose(out, ref, atol=1e-4, rtol=1e-4), float(jnp.max(jnp.abs(out - ref)))

    print("KERNEL_OK")
</pallas_src>

<mosaic_0001>
module attributes {stable_mosaic.version = 11 : i64} {
  func.func @_fused_kernel(%arg0: i32, %arg1: memref<16x1xi32, #tpu.memory_space<vmem>>, %arg2: memref<128x128xf32, #tpu.memory_space<vmem>>, %arg3: memref<128x128xf32, #tpu.memory_space<vmem>>, %arg4: memref<1x128xf32, #tpu.memory_space<vmem>>, %arg5: memref<128x128xf32, #tpu.memory_space<vmem>>, %arg6: memref<1x128xf32, #tpu.memory_space<vmem>>, %arg7: memref<16x128xf32, #tpu.memory_space<vmem>>) attributes {dimension_semantics = [#tpu.dimension_semantics<parallel>], iteration_bounds = array<i64: 1>, scalar_prefetch = 0 : i64, scratch_operands = 0 : i64, tpu.core_type = #tpu.core_type<tc>, window_params = [{transform_indices = @transform_0, window_bounds = array<i64: 16, 1>}, {pipeline_mode = #tpu.pipeline_mode<synchronous>, transform_indices = @transform_1, window_bounds = array<i64: 128, 128>}, {pipeline_mode = #tpu.pipeline_mode<synchronous>, transform_indices = @transform_2, window_bounds = array<i64: 128, 128>}, {pipeline_mode = #tpu.pipeline_mode<synchronous>, transform_indices = @transform_3, window_bounds = array<i64: 1, 128>}, {pipeline_mode = #tpu.pipeline_mode<synchronous>, transform_indices = @transform_4, window_bounds = array<i64: 128, 128>}, {pipeline_mode = #tpu.pipeline_mode<synchronous>, transform_indices = @transform_5, window_bounds = array<i64: 1, 128>}, {transform_indices = @transform_6, window_bounds = array<i64: 16, 128>}]} {
    %c0 = arith.constant 0 : index
    %c0_0 = arith.constant 0 : index
    %0 = vector.load %arg1[%c0, %c0_0] : memref<16x1xi32, #tpu.memory_space<vmem>>, vector<16x1xi32>
    %1 = tpu.iota {dimensions = array<i32: 1>} : vector<16x128xi32>
    %2 = vector.broadcast %0 : vector<16x1xi32> to vector<16x128xi32>
    %3 = arith.cmpi eq, %2, %1 : vector<16x128xi32>
    %4 = arith.extui %3 : vector<16x128xi1> to vector<16x128xi32>
    %5 = arith.sitofp %4 : vector<16x128xi32> to vector<16x128xf32>
    %c0_1 = arith.constant 0 : index
    %c0_2 = arith.constant 0 : index
    %6 = vector.load %arg2[%c0_1, %c0_2] : memref<128x128xf32, #tpu.memory_space<vmem>>, vector<128x128xf32>
    %cst = arith.constant dense<0.000000e+00> : vector<16x128xf32>
    %7 = tpu.matmul %5, %6, %cst {dimension_numbers = #tpu.dot_dimension_numbers<[1], [0], [0], [1], [0, 0, 1, 1], [], []>} : vector<16x128xf32>, vector<128x128xf32>, vector<16x128xf32> -> vector<16x128xf32>
    %c0_3 = arith.constant 0 : index
    %c0_4 = arith.constant 0 : index
    %8 = vector.load %arg3[%c0_3, %c0_4] : memref<128x128xf32, #tpu.memory_space<vmem>>, vector<128x128xf32>
    %cst_5 = arith.constant dense<0.000000e+00> : vector<16x128xf32>
    %9 = tpu.matmul %7, %8, %cst_5 {dimension_numbers = #tpu.dot_dimension_numbers<[1], [0], [0], [1], [0, 0, 1, 1], [], []>} : vector<16x128xf32>, vector<128x128xf32>, vector<16x128xf32> -> vector<16x128xf32>
    %c0_6 = arith.constant 0 : index
    %c0_7 = arith.constant 0 : index
    %10 = vector.load %arg4[%c0_6, %c0_7] : memref<1x128xf32, #tpu.memory_space<vmem>>, vector<1x128xf32>
    %11 = vector.broadcast %10 : vector<1x128xf32> to vector<16x128xf32>
    %12 = arith.addf %9, %11 : vector<16x128xf32>
    %cst_8 = arith.constant 0.000000e+00 : f32
    %13 = vector.broadcast %cst_8 : f32 to vector<16x128xf32>
    %14 = arith.maximumf %12, %13 : vector<16x128xf32>
    %c0_9 = arith.constant 0 : index
    %c0_10 = arith.constant 0 : index
    %15 = vector.load %arg5[%c0_9, %c0_10] : memref<128x128xf32, #tpu.memory_space<vmem>>, vector<128x128xf32>
    %cst_11 = arith.constant dense<0.000000e+00> : vector<16x128xf32>
    %16 = tpu.matmul %14, %15, %cst_11 {dimension_numbers = #tpu.dot_dimension_numbers<[1], [0], [0], [1], [0, 0, 1, 1], [], []>} : vector<16x128xf32>, vector<128x128xf32>, vector<16x128xf32> -> vector<16x128xf32>
    %c0_12 = arith.constant 0 : index
    %c0_13 = arith.constant 0 : index
    %17 = vector.load %arg6[%c0_12, %c0_13] : memref<1x128xf32, #tpu.memory_space<vmem>>, vector<1x128xf32>
    %18 = vector.broadcast %17 : vector<1x128xf32> to vector<16x128xf32>
    %19 = arith.addf %16, %18 : vector<16x128xf32>
    %c0_14 = arith.constant 0 : index
    %c0_15 = arith.constant 0 : index
    %20 = vector.load %arg7[%c0_14, %c0_15] : memref<16x128xf32, #tpu.memory_space<vmem>>, vector<16x128xf32>
    tpu.vector_store %arg7[%c0_14, %c0_15], %19 {strides = array<i32>} : memref<16x128xf32, #tpu.memory_space<vmem>>, vector<16x128xf32>,
    return
  }
  func.func @transform_0(%arg0: i32) -> (i32, i32) {
    %c0_i32 = arith.constant 0 : i32
    %c0_i32_0 = arith.constant 0 : i32
    return %arg0, %c0_i32 : i32, i32
  }
  func.func @transform_1(%arg0: i32) -> (i32, i32) {
    %c0_i32 = arith.constant 0 : i32
    %c0_i32_0 = arith.constant 0 : i32
    %c0_i32_1 = arith.constant 0 : i32
    return %c0_i32, %c0_i32_0 : i32, i32
  }
  func.func @transform_2(%arg0: i32) -> (i32, i32) {
    %c0_i32 = arith.constant 0 : i32
    %c0_i32_0 = arith.constant 0 : i32
    %c0_i32_1 = arith.constant 0 : i32
    return %c0_i32, %c0_i32_0 : i32, i32
  }
  func.func @transform_3(%arg0: i32) -> (i32, i32) {
    %c0_i32 = arith.constant 0 : i32
    %c0_i32_0 = arith.constant 0 : i32
    %c0_i32_1 = arith.constant 0 : i32
    return %c0_i32, %c0_i32_0 : i32, i32
  }
  func.func @transform_4(%arg0: i32) -> (i32, i32) {
    %c0_i32 = arith.constant 0 : i32
    %c0_i32_0 = arith.constant 0 : i32
    %c0_i32_1 = arith.constant 0 : i32
    return %c0_i32, %c0_i32_0 : i32, i32
  }
  func.func @transform_5(%arg0: i32) -> (i32, i32) {
    %c0_i32 = arith.constant 0 : i32
    %c0_i32_0 = arith.constant 0 : i32
    %c0_i32_1 = arith.constant 0 : i32
    return %c0_i32, %c0_i32_0 : i32, i32
  }
  func.func @transform_6(%arg0: i32) -> (i32, i32) {
    %c0_i32 = arith.constant 0 : i32
    %c0_i32_0 = arith.constant 0 : i32
    return %arg0, %c0_i32 : i32, i32
  }
}

</mosaic_0001>

<bundles_post_ra>
// kernel: tpu_custom_call.1
= control target key start
LH: loop header
LB: loop body
LE: loop exit
PB: predicated region body
PF: predicated region fallthrough
CT: control target
= control target key end

     0   :  { %11 = vsyncpa [#allocation3], 0  ;;  %s876_s0 = inlined_call_operand.vmem [shape: s32[16,1], index: 0, kind: input, shape index: {}]   ;;  %s877_s1 = inlined_call_operand.hbm [shape: f32[128,128], index: 1, kind: input, shape index: {}]   ;;  %s878_s2 = inlined_call_operand.hbm [shape: f32[128,128], index: 2, kind: input, shape index: {}]   ;;  %s879_s3 = inlined_call_operand.vmem [shape: f32[1,128], index: 3, kind: input, shape index: {}]   ;;  %s880_s4 = inlined_call_operand.hbm [shape: f32[128,128], index: 4, kind: input, shape index: {}]   ;;  %s881_s5 = inlined_call_operand.vmem [shape: f32[1,128], index: 5, kind: input, shape index: {}]   ;;  %s882_s6 = inlined_call_operand.hbm [shape: f32[16,128], index: 6, kind: output, shape index: {}]  }
   0x1   :  { %12 = vsyncpa [#allocation6], 0 }
   0x2   :  { %13 = vsyncpa [#allocation4], 0  ;;  %s754_s21 = smov [#allocation5]   ;;  %s755_s23 = smov [#allocation2]  }
   0x3   :  { %s33_s22 = sshll.u32 %s754_s21, 4  ;;  %s21_s24 = sshll.u32 %s755_s23, 4  ;;  %s34_s22 = int_to_ptr.vmem [resolvable:$true] %s33_s22  ;;  %s797_s24 = int_to_ptr.vmem [resolvable:$true] %s21_s24 }
   0x4   :  { %s660_s27 = scalar_lea.hbm %s878_s2, 2048 }
   0x5   :  { %p661_p0 = scmp.ne.s32.totalorder %s878_s2, %s660_s27  ;;  %p664_p1 = scmp.lt.u32.totalorder %s660_s27, %s878_s2 }
   0x7   :  { %p666_p2 = pnand %p664_p1, %p661_p0 }
   0x9   :  { %669 = shalt.err (!%p666_p2)
}
   0xa   :  { %s670_s8 = scalar_lea.vmem %s34_s22, 2048  ;;  %p675_p4 = scmp.lt.s32.totalorder %s34_s22, %s34_s22 }
   0xb   :  { %p671_p3 = scmp.ne.s32.totalorder %s34_s22, %s670_s8  ;;  %p676_p5 = scmp.lt.s32.totalorder %s670_s8, %s670_s8 }
   0xd   :  { %p677_p6 = por %p676_p5, %p675_p4 }
   0xf   :  { %p678_p7 = pnand %p677_p6, %p671_p3 }
  0x11   :  { %681 = shalt.err (!%p678_p7)
}
  0x12   :  { %s756_s9 = smov 128   ;;  %s757_s10 = smov 8  }
  0x13   :  { %39 = dma.hbm_to_vmem [thread:$0]  %s878_s2, 2048, %s34_s22, [#allocation6], %s756_s9, %s756_s9, %s757_s10  }
  0x14   :  { %s682_s15 = scalar_lea.hbm %s877_s1, 2048 }
  0x15   :  { %p683_p8 = scmp.ne.s32.totalorder %s877_s1, %s682_s15  ;;  %p686_p9 = scmp.lt.u32.totalorder %s682_s15, %s877_s1 }
  0x17   :  { %p688_p10 = pnand %p686_p9, %p683_p8 }
  0x19   :  { %691 = shalt.err (!%p688_p10)
}
  0x1a   :  { %s692_s20 = scalar_lea.vmem %s797_s24, 2048  ;;  %p697_p12 = scmp.lt.s32.totalorder %s797_s24, %s797_s24 }
  0x1b   :  { %p693_p11 = scmp.ne.s32.totalorder %s797_s24, %s692_s20  ;;  %p698_p13 = scmp.lt.s32.totalorder %s692_s20, %s692_s20 }
  0x1d   :  { %p699_p0 = por %p698_p13, %p697_p12 }
  0x1f   :  { %p700_p1 = pnand %p699_p0, %p693_p11 }
  0x21   :  { %703 = shalt.err (!%p700_p1)
}
  0x22   :  { %27 = dma.hbm_to_vmem [thread:$0]  %s877_s1, 2048, %s797_s24, [#allocation3], %s756_s9, %s756_s9, %s757_s10  }
  0x23   :  { %s758_s22 = smov [#allocation7]   ;;  %s704_s27 = scalar_lea.hbm %s880_s4, 2048 }
  0x24   :  { %s47_s23 = sshll.u32 %s758_s22, 4  ;;  %p705_p2 = scmp.ne.s32.totalorder %s880_s4, %s704_s27  ;;  %s48_s23 = int_to_ptr.vmem [resolvable:$true] %s47_s23 }
  0x25   :  { %p708_p3 = scmp.lt.u32.totalorder %s704_s27, %s880_s4 }
  0x27   :  { %p710_p4 = pnand %p708_p3, %p705_p2 }
  0x29   :  { %713 = shalt.err (!%p710_p4)
}
  0x2a   :  { %s714_s8 = scalar_lea.vmem %s48_s23, 2048  ;;  %p719_p6 = scmp.lt.s32.totalorder %s48_s23, %s48_s23 }
  0x2b   :  { %p715_p5 = scmp.ne.s32.totalorder %s48_s23, %s714_s8  ;;  %p720_p7 = scmp.lt.s32.totalorder %s714_s8, %s714_s8 }
  0x2d   :  { %p721_p8 = por %p720_p7, %p719_p6 }
  0x2f   :  { %p722_p9 = pnand %p721_p8, %p715_p5 }
  0x31   :  { %725 = shalt.err (!%p722_p9)
}
  0x32   :  { %53 = dma.hbm_to_vmem [thread:$0]  %s880_s4, 2048, %s48_s23, [#allocation6], %s756_s9, %s756_s9, %s757_s10  }
  0x33   :  { %748 = dma.done.wait [#allocation3], 2048  }
  0x34   :  { %749 = vsyncadd [#allocation3], 4294965248 }
  0x35   :  { %750 = dma.done.wait [#allocation6], 4096  }
  0x36   :  { %751 = vsyncadd [#allocation6], 4294963200  ;;  %v759_v0 = vmov 0   ;;  %v65_v1 = vld [vmem:[%s876_s0] sm:$0xff]  ;;  %v82_v3 = vld [vmem:[#allocation2 + $0x8] sm:$0xff]  ;;  %v67_v51 = vlaneseq  ;;  %v760_v54 = vmov 1.0  }
  0x37   :  { %659 = vset.pattern.permute.xlu0 %v759_v0  ;;  %v81_v2 = vld [vmem:[#allocation2] sm:$0xff]  ;;  %v83_v4 = vld [vmem:[#allocation2 + $0x10] sm:$0xff]  ;;  %v84_v5 = vld [vmem:[#allocation2 + $0x18] sm:$0xff]  ;;  %s761_s17 = smov [#allocation8]  }
  0x38   :  { %70 = vperm.xlu0 %659, %v65_v1   ;;  %v66_v6 = vld [vmem:[%s876_s0 + $0x8] sm:$0xff]  ;;  %v555_v7 = vpack.c.bf16 %v82_v3, %v81_v2  ;;  %v559_v8 = vpack.c.bf16 %v84_v5, %v83_v4  ;;  %v85_v9 = vld [vmem:[#allocation2 + $0x20] sm:$0xff]  ;;  %v174_v14 = vld [vmem:[#allocation5 + $0x10] sm:$0xff]  ;;  %v68_v52 = vand.u32 127, %v67_v51  ;;  %s377_s18 = sshll.u32 %s761_s17, 4  ;;  %s378_s18 = int_to_ptr.vmem [resolvable:$true] %s377_s18 }
  0x39   :  { %v86_v10 = vld [vmem:[#allocation2 + $0x28] sm:$0xff]  ;;  %v172_v12 = vld [vmem:[#allocation5] sm:$0xff]  ;;  %v87_v15 = vld [vmem:[#allocation2 + $0x30] sm:$0xff]  ;;  %p731_p11 = scmp.lt.s32.totalorder %s378_s18, %s378_s18 }
  0x3a   :  { %556 = vmatprep.subr.bf16.mxu0 %v555_v7  ;;  %v563_v11 = vpack.c.bf16 %v86_v10, %v85_v9  ;;  %v173_v13 = vld [vmem:[#allocation5 + $0x8] sm:$0xff]  ;;  %v88_v16 = vld [vmem:[#allocation2 + $0x38] sm:$0xff]  ;;  %v176_v20 = vld [vmem:[#allocation5 + $0x20] sm:$0xff] }
  0x3b   :  { %558 = vmatpush3.bf16.msra.mxu0 %v555_v7  ;;  %v587_v17 = vpack.c.bf16 %v173_v13, %v172_v12  ;;  %v175_v18 = vld [vmem:[#allocation5 + $0x18] sm:$0xff]  ;;  %v177_v21 = vld [vmem:[#allocation5 + $0x28] sm:$0xff]  ;;  %v567_v22 = vpack.c.bf16 %v88_v16, %v87_v15  ;;  %v89_v23 = vld [vmem:[#allocation2 + $0x40] sm:$0xff] }
  0x3c   :  { %73 = vperm.xlu0 %659, %v66_v6   ;;  %560 = vmatprep.subr.bf16.mxu0 %v559_v8  ;;  %v591_v19 = vpack.c.bf16 %v175_v18, %v174_v14  ;;  %v90_v24 = vld [vmem:[#allocation2 + $0x48] sm:$0xff]  ;;  %v595_v25 = vpack.c.bf16 %v177_v21, %v176_v20  ;;  %v178_v26 = vld [vmem:[#allocation5 + $0x30] sm:$0xff]  ;;  %v179_v27 = vld [vmem:[#allocation5 + $0x38] sm:$0xff] }
  0x3d   :  { %588 = vmatprep.subr.bf16.mxu1 %v587_v17  ;;  %v571_v28 = vpack.c.bf16 %v90_v24, %v89_v23  ;;  %v91_v29 = vld [vmem:[#allocation2 + $0x50] sm:$0xff]  ;;  %v92_v30 = vld [vmem:[#allocation2 + $0x58] sm:$0xff]  ;;  %v599_v31 = vpack.c.bf16 %v179_v27, %v178_v26  ;;  %v180_v32 = vld [vmem:[#allocation5 + $0x40] sm:$0xff] }
  0x3e   :  { %590 = vmatpush3.bf16.msra.mxu1 %v587_v17  ;;  %v181_v33 = vld [vmem:[#allocation5 + $0x48] sm:$0xff]  ;;  %v575_v34 = vpack.c.bf16 %v92_v30, %v91_v29  ;;  %v93_v35 = vld [vmem:[#allocation2 + $0x60] sm:$0xff]  ;;  %v182_v38 = vld [vmem:[#allocation5 + $0x50] sm:$0xff] }
  0x3f   :  { %562 = vmatpush3.bf16.msra.mxu0 %v559_v8  ;;  %592 = vmatprep.subr.bf16.mxu1 %v591_v19  ;;  %v94_v36 = vld [vmem:[#allocation2 + $0x68] sm:$0xff]  ;;  %v603_v37 = vpack.c.bf16 %v181_v33, %v180_v32  ;;  %v183_v39 = vld [vmem:[#allocation5 + $0x58] sm:$0xff]  ;;  %v95_v41 = vld [vmem:[#allocation2 + $0x70] sm:$0xff] }
  0x40   :  { %564 = vmatprep.subr.bf16.mxu0 %v563_v11  ;;  %v579_v40 = vpack.c.bf16 %v94_v36, %v93_v35  ;;  %v96_v42 = vld [vmem:[#allocation2 + $0x78] sm:$0xff]  ;;  %v607_v43 = vpack.c.bf16 %v183_v39, %v182_v38  ;;  %v184_v44 = vld [vmem:[#allocation5 + $0x60] sm:$0xff]  ;;  %v185_v45 = vld [vmem:[#allocation5 + $0x68] sm:$0xff] }
  0x41   :  { %v583_v46 = vpack.c.bf16 %v96_v42, %v95_v41  ;;  %v611_v47 = vpack.c.bf16 %v185_v45, %v184_v44  ;;  %v186_v48 = vld [vmem:[#allocation5 + $0x70] sm:$0xff]  ;;  %v187_v49 = vld [vmem:[#allocation5 + $0x78] sm:$0xff]  ;;  %v272_v56 = vld [vmem:[#allocation7] sm:$0xff] }
  0x42   :  { %594 = vmatpush3.bf16.msra.mxu1 %v591_v19  ;;  %v615_v50 = vpack.c.bf16 %v187_v49, %v186_v48  ;;  %v273_v57 = vld [vmem:[#allocation7 + $0x8] sm:$0xff]  ;;  %v274_v58 = vld [vmem:[#allocation7 + $0x10] sm:$0xff]  ;;  %v275_v60 = vld [vmem:[#allocation7 + $0x18] sm:$0xff] }
  0x43   :  { %566 = vmatpush3.bf16.msra.mxu0 %v563_v11  ;;  %596 = vmatprep.subr.bf16.mxu1 %v595_v25  ;;  %v619_v59 = vpack.c.bf16 %v273_v57, %v272_v56  ;;  %v623_v61 = vpack.c.bf16 %v275_v60, %v274_v58  ;;  %v276_v62 = vld [vmem:[#allocation7 + $0x20] sm:$0xff]  ;;  %v277_v63 = vld [vmem:[#allocation7 + $0x28] sm:$0xff]  ;;  %v278_v1 = vld [vmem:[#allocation7 + $0x30] sm:$0xff] }
  0x44   :  { %568 = vmatprep.subr.bf16.mxu0 %v567_v22  ;;  %v627_v0 = vpack.c.bf16 %v277_v63, %v276_v62  ;;  %v279_v2 = vld [vmem:[#allocation7 + $0x38] sm:$0xff]  ;;  %v280_v4 = vld [vmem:[#allocation7 + $0x40] sm:$0xff]  ;;  %v281_v5 = vld [vmem:[#allocation7 + $0x48] sm:$0xff] }
  0x45   :  { %v631_v3 = vpack.c.bf16 %v279_v2, %v278_v1  ;;  %v635_v6 = vpack.c.bf16 %v281_v5, %v280_v4  ;;  %v282_v7 = vld [vmem:[#allocation7 + $0x50] sm:$0xff]  ;;  %v283_v8 = vld [vmem:[#allocation7 + $0x58] sm:$0xff]  ;;  %v284_v10 = vld [vmem:[#allocation7 + $0x60] sm:$0xff] }
  0x46   :  { %598 = vmatpush3.bf16.msra.mxu1 %v595_v25  ;;  %v639_v9 = vpack.c.bf16 %v283_v8, %v282_v7  ;;  %v285_v11 = vld [vmem:[#allocation7 + $0x68] sm:$0xff]  ;;  %v286_v15 = vld [vmem:[#allocation7 + $0x70] sm:$0xff]  ;;  %v287_v16 = vld [vmem:[#allocation7 + $0x78] sm:$0xff] }
  0x47   :  { %570 = vmatpush3.bf16.msra.mxu0 %v567_v22  ;;  %600 = vmatprep.subr.bf16.mxu1 %v599_v31  ;;  %v643_v12 = vpack.c.bf16 %v285_v11, %v284_v10  ;;  %v647_v17 = vpack.c.bf16 %v287_v16, %v286_v15  ;;  %v394_v18 = vld [vmem:[%s879_s3] ss:$0 sm:$0xff]  ;;  %s726_s3 = scalar_lea.vmem %s378_s18, 256 }
  0x48   :  { %572 = vmatprep.subr.bf16.mxu0 %v571_v28  ;;  %v395_v25 = vld [vmem:[%s881_s5] ss:$0 sm:$0xff]  ;;  %p727_p10 = scmp.ne.s32.totalorder %s378_s18, %s726_s3  ;;  %p732_p12 = scmp.lt.s32.totalorder %s726_s3, %s726_s3 }
  0x4a   :  { %602 = vmatpush3.bf16.msra.mxu1 %v599_v31  ;;  %p733_p13 = por %p732_p12, %p731_p11 }
  0x4b   :  { %574 = vmatpush3.bf16.msra.mxu0 %v571_v28  ;;  %604 = vmatprep.subr.bf16.mxu1 %v603_v37 }
  0x4c   :  { %576 = vmatprep.subr.bf16.mxu0 %v575_v34  ;;  %p734_p0 = pnand %p733_p13, %p727_p10 }
  0x4e   :  { %606 = vmatpush3.bf16.msra.mxu1 %v603_v37 }
  0x4f   :  { %578 = vmatpush3.bf16.msra.mxu0 %v575_v34  ;;  %608 = vmatprep.subr.bf16.mxu1 %v607_v43 }
  0x50   :  { %580 = vmatprep.subr.bf16.mxu0 %v579_v40 }
  0x52   :  { %610 = vmatpush3.bf16.msra.mxu1 %v607_v43 }
  0x53   :  { %582 = vmatpush3.bf16.msra.mxu0 %v579_v40  ;;  %612 = vmatprep.subr.bf16.mxu1 %v611_v47 }
  0x54   :  { %584 = vmatprep.subr.bf16.mxu0 %v583_v46 }
  0x56   :  { %614 = vmatpush3.bf16.msra.mxu1 %v611_v47 }
  0x57   :  { %586 = vmatpush3.bf16.msra.mxu0 %v583_v46  ;;  %616 = vmatprep.subr.bf16.mxu1 %v615_v50 }
  0x58   :  { %620 = vmatprep.subr.bf16.mxu0 %v619_v59 }
  0x5a   :  { %618 = vmatpush3.bf16.msra.mxu1 %v615_v50 }
  0xb7   :  { %v71_v53 = vpop.permute.xlu0 %70 }
  0xb8   :  { %vm75_vm0 = vcmp.eq.s32.totalorder %v71_v53, %v68_v52 }
  0xb9   :  { %482 = vmatprep.mubr.msk.f32.mxu0 %vm75_vm0, %v760_v54 }
  0xbb   :  { %v74_v55 = vpop.permute.xlu0 %73 }
  0xbc   :  { %vm76_vm1 = vcmp.eq.s32.totalorder %v74_v55, %v68_v52 }
  0xbd   :  { %483 = vmatmul.mubr.msk.f32.vlgmr.msra.gmra.mrb[0].mxu0 %vm76_vm1, %v760_v54 }
  0xbe   :  { %622 = vmatpush3.bf16.msra.mxu0 %v619_v59 }
  0xbf   :  { %624 = vmatprep.subr.bf16.mxu0 %v623_v61 }
  0xc2   :  { %626 = vmatpush3.bf16.msra.mxu0 %v623_v61 }
  0xc3   :  { %628 = vmatprep.subr.bf16.mxu0 %v627_v0 }
  0xc6   :  { %630 = vmatpush3.bf16.msra.mxu0 %v627_v0 }
  0xc7   :  { %632 = vmatprep.subr.bf16.mxu0 %v631_v3 }
  0xca   :  { %634 = vmatpush3.bf16.msra.mxu0 %v631_v3 }
  0xcb   :  { %636 = vmatprep.subr.bf16.mxu0 %v635_v6 }
  0xce   :  { %638 = vmatpush3.bf16.msra.mxu0 %v635_v6 }
  0xcf   :  { %640 = vmatprep.subr.bf16.mxu0 %v639_v9 }
  0xd2   :  { %642 = vmatpush3.bf16.msra.mxu0 %v639_v9 }
  0xd3   :  { %644 = vmatprep.subr.bf16.mxu0 %v643_v12 }
  0xd6   :  { %646 = vmatpush3.bf16.msra.mxu0 %v643_v12 }
  0xd7   :  { %648 = vmatprep.subr.bf16.mxu0 %v647_v17 }
  0xda   :  { %650 = vmatpush3.bf16.msra.mxu0 %v647_v17 }
 0x190   :  { %v484_v13 = vpop.f32.mrb[0].mxu0 }
 0x191   :  { %v163_v14 = vpop.f32.mrb[1].mxu0 }
 0x192   :  { %517 = vmatprep.mubr.f32.mxu1 %v163_v14 }
 0x193   :  { %518 = vmatmul.mubr.f32.vlgmr.msra.gmra.mrb[0].mxu1 %v484_v13 }
 0x266   :  { %v519_v19 = vpop.f32.mrb[0].mxu1 }
 0x267   :  { %v267_v20 = vadd.f32 %v519_v19, %v394_v18  ;;  %v261_v21 = vpop.f32.mrb[1].mxu1 }
 0x268   :  { %v262_v22 = vadd.f32 %v394_v18, %v261_v21 }
 0x269   :  { %v271_v24 = vmax.f32 %v267_v20, 0.0 }
 0x26a   :  { %v270_v23 = vmax.f32 %v262_v22, 0.0 }
 0x26c   :  { %552 = vmatprep.mubr.f32.mxu0 %v270_v23 }
 0x26d   :  { %553 = vmatmul.mubr.f32.vlgmr.msra.gmra.mrb[2].mxu0 %v271_v24 }
 0x340   :  { %v554_v26 = vpop.f32.mrb[2].mxu0 }
 0x341   :  { %v367_v27 = vadd.f32 %v554_v26, %v395_v25  ;;  %v361_v28 = vpop.f32.mrb[3].mxu0 }
 0x342   :  { %v362_v29 = vadd.f32 %v395_v25, %v361_v28 }
 0x343   :  { %371 = vst [vmem:[#allocation8 + $0x8] sm:$0xff] %v367_v27 }
 0x344   :  { %370 = vst [vmem:[#allocation8] sm:$0xff] %v362_v29 }
 0x345   :  { %737 = shalt.err (!%p734_p0)
}
 0x346   :  { %s738_s5 = scalar_lea.hbm %s882_s6, 256 }
 0x347   :  { %p739_p1 = scmp.ne.s32.totalorder %s882_s6, %s738_s5  ;;  %p742_p2 = scmp.lt.u32.totalorder %s738_s5, %s882_s6 }
 0x349   :  { %p744_p3 = pnand %p742_p2, %p739_p1 }
 0x34b   :  { %747 = shalt.err (!%p744_p3)
}
 0x34c   :  { %383 = dma.vmem_to_hbm [thread:$0]  %s378_s18, 256, %s882_s6, [#allocation4], %s756_s9, %s756_s9, %s757_s10  }
 0x34d   :  { %752 = dma.done.wait [#allocation4], 256  }
 0x34e   :  { %753 = vsyncadd [#allocation4], 4294967040 }
 0x34f   :  { %387 = vsyncpa [#allocation3], 1 }
 0x350   :  { %388 = vsyncpa [#allocation6], 1 }
 0x351   :  { %389 = vsyncpa [#allocation4], 1 }

</bundles_post_ra>
